<compile_context>
chip_gen: v7x
topology: tpu7x:2x2x1
jax: 0.10.0
libtpu: 0.0.40
codegen_flags: <defaults>
</compile_context>

<pallas_src>
import functools

import jax
import jax.numpy as jnp
from jax.experimental import pallas as pl
from jax.experimental.pallas import tpu as pltpu


def _round_up(x, m):
    return (x + m - 1) // m * m


def _tcn_matmul_kernel(x_ref, w_ref, bias_ref, o_ref):
    # x_ref:    (K*C_in, TILE_L)  bf16 im2col tile (one batch element, one lane tile)
    # w_ref:    (C_out, K*C_in)   bf16, BN scale already folded in
    # bias_ref: (C_out, 1)        f32 folded conv-bias + BN shift
    # o_ref:    (C_out, TILE_L)   f32
    acc = jnp.dot(w_ref[...], x_ref[...], preferred_element_type=jnp.float32)
    o_ref[...] = (acc + bias_ref[...]).astype(o_ref.dtype)


def unit_tcn_sparse_forward(x, conv_w, conv_b, bn_gamma, bn_beta, bn_mean, bn_var,
                            *, kernel_size=9, stride=1, dilation=1, sparsity=0.0,
                            eps=1e-5, lane_tile=1024):
    """Forward of unit_tcn_sparse.  x: (N, C_in, T, V) f32 -> (N, C_out, T_out, V) f32."""
    N, C_in, T, V = x.shape
    C_out = conv_w.shape[0]
    K = kernel_size
    pad = (K + (K - 1) * (dilation - 1) - 1) // 2
    T_out = (T + 2 * pad - dilation * (K - 1) - 1) // stride + 1
    KC = K * C_in

    # --- glue: sparsity mask on the weights (SparseConv2d semantics; sparsity=0 -> dense) ---
    w = conv_w[:, :, :, 0].astype(jnp.float32)            # (C_out, C_in, K)
    if sparsity > 0:
        # TODO(synk): PyTorch-style magnitude pruning uses kth-value/topk; jnp.quantile
        # interpolates, so a few boundary weights may differ at sparsity>0.
        thresh = jnp.quantile(jnp.abs(w), sparsity)
        w = jnp.where(jnp.abs(w) > thresh, w, 0.0)

    # --- glue: fold BN scale into the weights, keep only a bias add in the epilogue ---
    scale = bn_gamma / jnp.sqrt(bn_var + eps)                                   # (C_out,)
    bias = (scale * (conv_b - bn_mean) + bn_beta).reshape(C_out, 1).astype(jnp.float32)
    # dense 2-D weight (C_out, K*C_in), K-major to match the im2col layout below
    w_flat = (jnp.transpose(w, (0, 2, 1)) * scale[:, None, None]).reshape(C_out, KC)
    w_flat = w_flat.astype(jnp.bfloat16)

    # --- glue: im2col -> (N, K*C_in, T_out*V) in bf16, lane axis padded to the tile size ---
    x_pad = jnp.pad(x, ((0, 0), (0, 0), (pad, pad), (0, 0))).astype(jnp.bfloat16)
    taps = [
        x_pad[:, :, k * dilation: k * dilation + (T_out - 1) * stride + 1: stride, :]
        for k in range(K)
    ]                                                       # each (N, C_in, T_out, V)
    x_col = jnp.stack(taps, axis=1).reshape(N, KC, T_out * V)

    L = T_out * V
    TILE_L = min(_round_up(L, 128), max(128, _round_up(lane_tile, 128)))
    L_pad = _round_up(L, TILE_L)
    if L_pad != L:
        x_col = jnp.pad(x_col, ((0, 0), (0, 0), (0, L_pad - L)))

    grid = (N, L_pad // TILE_L)

    # VMEM budget: double-buffered x/out blocks + resident weights + matmul temp.
    vmem_est = (2 * KC * TILE_L * 2          # x tile (bf16) x2 buffers
                + 2 * C_out * TILE_L * 4     # out tile (f32) x2 buffers
                + 2 * C_out * KC * 2         # weights (bf16) x2 buffers
                + 2 * C_out * 4              # bias
                + C_out * TILE_L * 4)        # f32 accumulator temp
    vmem_limit = int(min(max(4 * vmem_est, 8 << 20), 48 << 20))

    out = pl.pallas_call(
        _tcn_matmul_kernel,
        out_shape=jax.ShapeDtypeStruct((N, C_out, L_pad), jnp.float32),
        grid_spec=pltpu.PrefetchScalarGridSpec(
            num_scalar_prefetch=0,
            grid=grid,
            in_specs=[
                pl.BlockSpec((None, KC, TILE_L), lambda n, l: (n, 0, l)),
                pl.BlockSpec((C_out, KC), lambda n, l: (0, 0)),
                pl.BlockSpec((C_out, 1), lambda n, l: (0, 0)),
            ],
            out_specs=pl.BlockSpec((None, C_out, TILE_L), lambda n, l: (n, 0, l)),
        ),
        compiler_params=pltpu.CompilerParams(
            dimension_semantics=("parallel", "parallel"),
            vmem_limit_bytes=vmem_limit,
        ),
    )(x_col, w_flat, bias)

    return out[:, :, :L].reshape(N, C_out, T_out, V)


def _reference(x, conv_w, conv_b, bn_gamma, bn_beta, bn_mean, bn_var,
               *, kernel_size=9, stride=1, dilation=1, eps=1e-5):
    K = kernel_size
    pad = (K + (K - 1) * (dilation - 1) - 1) // 2
    y = jax.lax.conv_general_dilated(
        x, conv_w,
        window_strides=(stride, 1),
        padding=((pad, pad), (0, 0)),
        rhs_dilation=(dilation, 1),
        dimension_numbers=("NCHW", "OIHW", "NCHW"),
        preferred_element_type=jnp.float32,
    ) + conv_b[None, :, None, None]
    scale = bn_gamma / jnp.sqrt(bn_var + eps)
    return scale[None, :, None, None] * (y - bn_mean[None, :, None, None]) \
        + bn_beta[None, :, None, None]


if __name__ == "__main__":
    # Small shapes consistent with the module: x is (N, C_in, T, V).
    N, C_in, C_out, T, V = 2, 4, 8, 16, 16
    K = 9

    key = jax.random.PRNGKey(0)
    kx, kw, kb = jax.random.split(key, 3)

    x = jax.random.normal(kx, (N, C_in, T, V), dtype=jnp.float32)

    fan_in = C_in * K
    conv_w = jax.random.normal(kw, (C_out, C_in, K, 1), dtype=jnp.float32) / jnp.sqrt(fan_in)
    conv_b = 0.01 * jax.random.normal(kb, (C_out,), dtype=jnp.float32)
    bn_gamma = jnp.ones((C_out,), jnp.float32)
    bn_beta = jnp.zeros((C_out,), jnp.float32)
    bn_mean = jnp.zeros((C_out,), jnp.float32)
    bn_var = jnp.ones((C_out,), jnp.float32)

    # stride=1, dilation=1 (default module config)
    out = unit_tcn_sparse_forward(
        x, conv_w, conv_b, bn_gamma, bn_beta, bn_mean, bn_var,
        kernel_size=K, stride=1, dilation=1, sparsity=0.0)
    out = jax.block_until_ready(out)
    ref = _reference(x, conv_w, conv_b, bn_gamma, bn_beta, bn_mean, bn_var,
                     kernel_size=K, stride=1, dilation=1)
    assert out.shape == (N, C_out, T, V)
    # bf16 inputs with f32 accumulation vs f32 reference -> loose tolerance.
    assert jnp.allclose(out, ref, atol=5e-2, rtol=5e-2), float(jnp.max(jnp.abs(out - ref)))

    # stride=2 now supported via the strided im2col gather.
    out2 = unit_tcn_sparse_forward(
        x, conv_w, conv_b, bn_gamma, bn_beta, bn_mean, bn_var,
        kernel_size=K, stride=2, dilation=1, sparsity=0.0)
    out2 = jax.block_until_ready(out2)
    ref2 = _reference(x, conv_w, conv_b, bn_gamma, bn_beta, bn_mean, bn_var,
                      kernel_size=K, stride=2, dilation=1)
    assert out2.shape == ref2.shape
    assert jnp.allclose(out2, ref2, atol=5e-2, rtol=5e-2), float(jnp.max(jnp.abs(out2 - ref2)))

    print("KERNEL_OK")
</pallas_src>

<mosaic_0001>
module attributes {stable_mosaic.version = 11 : i64} {
  func.func @_tcn_matmul_kernel(%arg0: i32, %arg1: i32, %arg2: memref<1x36x256xbf16, #tpu.memory_space<vmem>>, %arg3: memref<8x36xbf16, #tpu.memory_space<vmem>>, %arg4: memref<8x1xf32, #tpu.memory_space<vmem>>, %arg5: memref<1x8x256xf32, #tpu.memory_space<vmem>>) attributes {dimension_semantics = [#tpu.dimension_semantics<parallel>, #tpu.dimension_semantics<parallel>], iteration_bounds = array<i64: 2, 1>, scalar_prefetch = 0 : i64, scratch_operands = 0 : i64, tpu.core_type = #tpu.core_type<tc>, window_params = [{transform_indices = @transform_0, window_bounds = array<i64: 1, 36, 256>}, {pipeline_mode = #tpu.pipeline_mode<synchronous>, transform_indices = @transform_1, window_bounds = array<i64: 8, 36>}, {pipeline_mode = #tpu.pipeline_mode<synchronous>, transform_indices = @transform_2, window_bounds = array<i64: 8, 1>}, {transform_indices = @transform_3, window_bounds = array<i64: 1, 8, 256>}]} {
    %c0 = arith.constant 0 : index
    %c0_0 = arith.constant 0 : index
    %0 = vector.load %arg3[%c0, %c0_0] : memref<8x36xbf16, #tpu.memory_space<vmem>>, vector<8x36xbf16>
    %c0_1 = arith.constant 0 : index
    %c0_2 = arith.constant 0 : index
    %c0_3 = arith.constant 0 : index
    %1 = vector.load %arg2[%c0_1, %c0_2, %c0_3] : memref<1x36x256xbf16, #tpu.memory_space<vmem>>, vector<1x36x256xbf16>
    %2 = vector.shape_cast %1 : vector<1x36x256xbf16> to vector<36x256xbf16>
    %cst = arith.constant dense<0.000000e+00> : vector<8x256xf32>
    %3 = tpu.matmul %0, %2, %cst {dimension_numbers = #tpu.dot_dimension_numbers<[1], [0], [0], [1], [0, 0, 1, 1], [], []>} : vector<8x36xbf16>, vector<36x256xbf16>, vector<8x256xf32> -> vector<8x256xf32>
    %c0_4 = arith.constant 0 : index
    %c0_5 = arith.constant 0 : index
    %4 = vector.load %arg4[%c0_4, %c0_5] : memref<8x1xf32, #tpu.memory_space<vmem>>, vector<8x1xf32>
    %5 = vector.broadcast %4 : vector<8x1xf32> to vector<8x256xf32>
    %6 = arith.addf %3, %5 : vector<8x256xf32>
    %c0_6 = arith.constant 0 : index
    %c0_7 = arith.constant 0 : index
    %c0_8 = arith.constant 0 : index
    %7 = vector.load %arg5[%c0_6, %c0_7, %c0_8] : memref<1x8x256xf32, #tpu.memory_space<vmem>>, vector<1x8x256xf32>
    %8 = vector.shape_cast %7 : vector<1x8x256xf32> to vector<8x256xf32>
    %9 = vector.shape_cast %6 : vector<8x256xf32> to vector<1x8x256xf32>
    tpu.vector_store %arg5[%c0_6, %c0_7, %c0_8], %9 {strides = array<i32>} : memref<1x8x256xf32, #tpu.memory_space<vmem>>, vector<1x8x256xf32>,
    return
  }
  func.func @transform_0(%arg0: i32, %arg1: i32) -> (i32, i32, i32) {
    %c0_i32 = arith.constant 0 : i32
    %c0_i32_0 = arith.constant 0 : i32
    return %arg0, %c0_i32, %arg1 : i32, i32, i32
  }
  func.func @transform_1(%arg0: i32, %arg1: i32) -> (i32, i32) {
    %c0_i32 = arith.constant 0 : i32
    %c0_i32_0 = arith.constant 0 : i32
    %c0_i32_1 = arith.constant 0 : i32
    return %c0_i32, %c0_i32_0 : i32, i32
  }
  func.func @transform_2(%arg0: i32, %arg1: i32) -> (i32, i32) {
    %c0_i32 = arith.constant 0 : i32
    %c0_i32_0 = arith.constant 0 : i32
    %c0_i32_1 = arith.constant 0 : i32
    return %c0_i32, %c0_i32_0 : i32, i32
  }
  func.func @transform_3(%arg0: i32, %arg1: i32) -> (i32, i32, i32) {
    %c0_i32 = arith.constant 0 : i32
    %c0_i32_0 = arith.constant 0 : i32
    return %arg0, %c0_i32, %arg1 : i32, i32, i32
  }
}

</mosaic_0001>

<bundles_post_ra>
// kernel: tpu_custom_call.1
= control target key start
LH: loop header
LB: loop body
LE: loop exit
PB: predicated region body
PF: predicated region fallthrough
CT: control target
= control target key end

     0   :  { %8 = vsyncpa [#allocation3], 0  ;;  %s692_s0 = inlined_call_operand.vmem [shape: bf16[2,36,256], index: 0, kind: input, shape index: {}]   ;;  %s693_s1 = inlined_call_operand.vmem [shape: bf16[8,36], index: 1, kind: input, shape index: {}]   ;;  %s694_s2 = inlined_call_operand.vmem [shape: f32[8,1], index: 2, kind: input, shape index: {}]   ;;  %s695_s3 = inlined_call_operand.hbm [shape: f32[2,8,256], index: 3, kind: output, shape index: {}]  }
   0x1   :  { %10 = vsyncpa [#allocation3 + $0x1], 0  ;;  %s574_s12 = smov 0   ;;  %s576_s13 = smov 0  }
   0x2   :  { %s578_s14 = smov 0   ;;  %s580_s15 = smov 0  }
   0x3   :  { %s582_s16 = smov 0   ;;  %s584_s17 = smov 0  }
   0x4 LB: > { %s385_s18 = sadd.s32 4294967295, %s550_s17   ;;  %s386_s19 = sadd.s32 4294967294, %s550_s17   ;;  %s550_s17 = sphi %s584_s17, %s16_s17   ;;  %s546_s16 = sphi %s582_s16, %s702_s16   ;;  %s542_s15 = sphi %s580_s15, %s701_s15   ;;  %s538_s14 = sphi %s578_s14, %s700_s14   ;;  %s534_s13 = sphi %s576_s13, %s699_s13   ;;  %s530_s12 = sphi %s574_s12, %s698_s12  }
   0x5   : > { %s28_s20 = sadd.s32 1, %s546_s16  ;;  %s107_s21 = sadd.s32 1, %s538_s14 }
   0x6   : > { %p30_p0 = scmp.ge.s32.totalorder %s28_s20, 2  ;;  %p117_p1 = scmp.ne.s32.totalorder %s538_s14, %s534_s13 }
   0x7   : > { %p118_p2 = scmp.eq.s32.totalorder %s385_s18, 1  ;;  %p123_p3 = scmp.ne.s32.totalorder %s534_s13, %s530_s12 }
   0x8   : > { %s704_s20 = smov (%p30_p0, %s28_s20), 0  ;;  %p124_p5 = scmp.eq.s32.totalorder %s386_s19, 1 }
   0x9   : > { %p614_p4 = por %p118_p2, %p117_p1  ;;  %s102_s23 = ssub.s32 %s546_s16, %s704_s20 }
   0xa   : > { %p389_p6 = scmp.ge.s32.totalorder %s550_s17, 1  ;;  %p105_p7 = scmp.eq.s32.totalorder %s102_s23, 0 }
   0xb   : > { %p621_p8 = por %p124_p5, %p123_p3  ;;  %p161_p9 = scmp.lt.s32.totalorder %s550_s17, 3 }
   0xc   : > { %s627_s25 = scalar_select %p105_p7, %s538_s14, %s107_s21  }
   0xd   : > { %p162_p10 = pnand %p389_p6, %p161_p9 }
   0xe   : > { %p190_p11 = scmp.lt.s32.totalorder (!%p162_p10), %s542_s15, 1  ;;  %v552_v0 = vmov (!%p162_p10), 0   ;;  %v207_v1 = vld [vmem:[%s694_s2] sm:$0xff] (!%p162_p10)  ;;  %vm242_vm0 = vcmask (!%p162_p10), 1041408   ;;  %vm238_vm1 = vcmask (!%p162_p10), 293888   ;;  %s186_s8 = sand.u32 (!%p162_p10), 1, %s534_s13  }
   0xf   : > { %165 = sbr.rel (%p162_p10) target bundleno = 269 (0x10d), region = 32  ;;  %281 = vmatprep.mubr.bf16.mxu0 (!%p162_p10), %v552_v0  ;;  %463 = vset.pattern.permute.xlu0 (!%p162_p10), %v552_v0  ;;  %v201_v10 = vld [vmem:[%s693_s1] sm:$0xf] (!%p162_p10)  ;;  %s390_s9 = sshll.u32 (!%p162_p10), %s186_s8, 4 }
  0x10   : > { %210 = vperm.xlu0 (!%p162_p10), %463, %v207_v1   ;;  %s405_s10 = sshll.u32 (!%p162_p10), %s542_s15, 8  ;;  %s188_s11 = scalar_lea.vmem (!%p162_p10), [#allocation2], %s390_s9 }
  0x11   : > { %s309_s18 = sshll.u32 (!%p162_p10), %s188_s11, 4  ;;  %s645_s23 = scalar_lea.hbm (!%p162_p10), %s695_s3, %s405_s10  ;;  %s647_s18 = int_to_ptr.vmem [resolvable:$true] %s309_s18 }
  0x12   : > { %s472_s26 = scalar_lea.vmem (!%p162_p10), %s647_s18, 256  ;;  %s553_s27 = smov (!%p162_p10), [#allocation2]  }
  0x13   : > { %p473_p12 = scmp.ne.s32.totalorder (!%p162_p10), %s647_s18, %s472_s26 }
  0x15   : > { %p474_p13 = pnand (!%p162_p10), %p473_p12, %p614_p4 }
  0x16   : > { %s191_s28 = scalar_select %p190_p11, %s542_s15, 1 }
  0x17   : > { %s293_s15 = scalar_lea.sflag [#allocation3], %s186_s8  ;;  %p475_p0 = pneg %p474_p13 }
  0x18   : > { %s406_s29 = smul.u32 40, %s191_s28  ;;  %s476_s28 = sshll.u32 %s553_s27, 4  ;;  %s477_s28 = int_to_ptr.vmem [resolvable:$false] %s476_s28 }
  0x19   : > { %p479_p1 = scmp.lt.s32.totalorder %s647_s18, %s477_s28 }
  0x1a   : > { %s197_s5 = scalar_lea.vmem %s692_s0, %s406_s29  ;;  %s478_s29 = scalar_lea.vmem %s477_s28, 512 }
  0x1b   : > { %v464_v2 = vld [vmem:[%s197_s5 + $0x4] ss:$8 sps:$4 sm:$0xff]   ;;  %v466_v3 = vld [vmem:[%s197_s5] ss:$8 sps:$4 sm:$0xff]   ;;  %v467_v4 = vld [vmem:[%s197_s5 + $0x14] ss:$8 sps:$4 sm:$0xff]   ;;  %p480_p2 = scmp.lt.s32.totalorder %s478_s29, %s472_s26 }
  0x1c   : > { %249 = vmatprep.subr.bf16.mxu0 %v464_v2  ;;  %v206_v5 = vld [vmem:[%s197_s5 + $0x20] sm:$0x33]  ;;  %v469_v6 = vld [vmem:[%s197_s5 + $0x10] ss:$8 sps:$4 sm:$0xff]  }
  0x1d   : > { %250 = vmatpush1.bf16.msra.mxu0 %v466_v3  ;;  %v397_v7 = vcombine.high %v206_v5, %v206_v5  ;;  %v396_v8 = vcombine.low %v206_v5, %v206_v5  ;;  %p481_p3 = por %p480_p2, %p479_p1 }
  0x1e   : > { %251 = vmatprep.subr.bf16.mxu0 %v467_v4 }
  0x1f   : > { %v244_v9 = vsel %vm242_vm0, %v396_v8, 0  ;;  %p482_p5 = pnand %p481_p3, %p475_p0 }
  0x21   : > { %252 = vmatpush1.bf16.msra.mxu0 %v469_v6 }
  0x22   : > { %398 = vmatprep.subr.msk.bf16.mxu0 %vm242_vm0, %v397_v7 }
  0x25   : > { %254 = vmatpush1.bf16.msra.mxu0 %v244_v9 }
  0x28   : > { %399 = vmatmul.mubr.msk.bf16.vlgmr.msra.gmra.mrb[0].mxu0 %vm238_vm1, %v201_v10 }
  0x8f   : > { %v211_v11 = vpop.permute.xlu0 %210 }
  0xfb   : > { %v283_v12 = vpop.f32.mrb[0].mxu0 }
  0xfc   : > { %v284_v13 = vadd.f32 %v283_v12, %v211_v11  ;;  %v285_v14 = vpop.f32.mrb[1].mxu0 }
  0xfd   : > { %v286_v15 = vadd.f32 %v285_v14, %v211_v11  ;;  %v287_v16 = vpop.f32.mrb[2].mxu0 }
  0xfe   : > { %290 = vst [vmem:[%s188_s11] sm:$0xff] %v284_v13  ;;  %v288_v17 = vpop.f32.mrb[3].mxu0 }
  0xff   : > { %291 = vst [vmem:[%s188_s11 + $0x8] sm:$0xff] %v286_v15 }
 0x100   : > { %485 = shalt.err (!%p482_p5)
}
 0x101   : > { %s486_s30 = scalar_lea.hbm %s645_s23, 256  ;;  %s490_s6 = scalar_lea.hbm %s695_s3, 512 }
 0x102   : > { %p487_p6 = scmp.ne.s32.totalorder %s645_s23, %s486_s30  ;;  %p491_p10 = scmp.lt.u32.totalorder %s645_s23, %s695_s3 }
 0x103   : > { %p492_p11 = scmp.lt.u32.totalorder %s490_s6, %s486_s30  ;;  %p494_p13 = scmp.lt.u32.totalorder %s486_s30, %s645_s23 }
 0x104   : > { %p488_p7 = pnand %p487_p6, %p614_p4 }
 0x105   : > { %p493_p12 = por %p492_p11, %p491_p10 }
 0x106   : > { %p489_p9 = pneg %p488_p7 }
 0x107   : > { %p495_p0 = por %p494_p13, %p493_p12 }
 0x109   : > { %p496_p1 = pnand %p495_p0, %p489_p9 }
 0x10b   : > { %499 = shalt.err (!%p496_p1)
}
 0x10c   : > { %407 = dma.vmem_to_hbm [thread:$0]  (%p614_p4), %s647_s18, 256, %s645_s23, %s293_s15  }
 0x10d PF: > { %p413_p2 = scmp.ge.s32.totalorder %s550_s17, 2  ;;  %s321_s9 = sand.u32 1, %s530_s12  }
 0x10e   : > { %s322_s10 = scalar_lea.sflag [#allocation3], %s321_s9 }
 0x10f   : > { %p410_p3 = pnand %p413_p2, %p621_p8 }
 0x111   : > { %525 = dma.done.wait (!%p410_p3), %s322_s10, 256  }
 0x112   : > { %527 = vsyncadd (!%p410_p3), %s322_s10, 4294967040  ;;  %s16_s17 = sadd.s32 1, %s550_s17   ;;  %s698_s12 = smov %s534_s13 }
 0x113   : > { %p13_p5 = scmp.ge.s32.totalorder %s16_s17, 4   ;;  %s699_s13 = smov %s538_s14 }
 0x114   : > { %s700_s14 = smov %s627_s25  ;;  %s701_s15 = smov %s546_s16 }
 0x115   : > { %s702_s16 = smov %s704_s20  ;;  %15 = sbr.rel (!%p13_p5) target bundleno = 4 (0x4), region = 67 }
 0x11c   :  { %327 = vsyncpa [#allocation3], 1 }
 0x11d   :  { %329 = vsyncpa [#allocation3 + $0x1], 1 }

</bundles_post_ra>
